<compile_context>
chip_gen: v6e
topology: v6e:2x2x1
jax: 0.10.0
libtpu: 0.0.40
codegen_flags: <defaults>
</compile_context>

<pallas_src>
import jax
import jax.numpy as jnp
from jax.experimental import pallas as pl
from jax.experimental.pallas import tpu as pltpu


def _copy_tile_kernel(x_ref, o_ref):
    # Identical in/out tile shapes -> straight VMEM tile copy, no slicing.
    o_ref[...] = x_ref[...]


def _round_up(x: int, m: int) -> int:
    return ((x + m - 1) // m) * m


def chomp1d(x: jax.Array, chomp_size: int, *, block_bytes: int = 4 << 20) -> jax.Array:
    """Pallas equivalent of Chomp1d(chomp_size)(x) for x of shape (N, C, L)."""
    assert x.ndim == 3, "expected (N, C, L)"
    n, c, l = x.shape
    assert 0 < chomp_size < l
    l_out = l - chomp_size

    # Flatten batch x channels into rows; length stays on the lane axis.
    rows = n * c
    x2 = x.reshape(rows, l)

    # Sublane packing per dtype width (f32: 8, bf16/f16: 16, int8/fp8: 32).
    itemsize = jnp.dtype(x.dtype).itemsize
    sublane = {4: 8, 2: 16, 1: 32}.get(itemsize, 8)

    rows_pad = _round_up(rows, sublane)
    l_pad = _round_up(l_out, 128)

    # --- Byte-budgeted, dtype-aware tile sizing -----------------------------
    # 1) Collapse the length axis whenever one sublane-pack of rows at full
    #    (padded) output length fits the budget; otherwise take the largest
    #    128-multiple lane tile that does.
    max_lanes = max(128, (block_bytes // (sublane * itemsize)) // 128 * 128)
    tl = min(l_pad, max_lanes)
    # 2) Fill the remaining budget with rows (multiples of the pack size).
    max_rows = max(sublane, (block_bytes // (tl * itemsize)) // sublane * sublane)
    tr = min(rows_pad, max_rows)

    # v7x megacore: if the grid collapsed to a single step but the block still
    # carries >= 1 MiB, split the row (or length) axis so both TensorCores
    # issue DMAs.  Measured-neutral on single-core v5e/v6e.
    if (pl.cdiv(rows, tr) * pl.cdiv(l_out, tl) == 1
            and tr * tl * itemsize >= (1 << 20)):
        if rows_pad >= 2 * sublane:
            tr = _round_up(-(-rows // 2), sublane)
        elif l_pad >= 2 * 128:
            tl = _round_up(-(-l_out // 2), 128)

    grid = (pl.cdiv(rows, tr), pl.cdiv(l_out, tl))

    out2 = pl.pallas_call(
        _copy_tile_kernel,
        out_shape=jax.ShapeDtypeStruct((rows, l_out), x.dtype),
        grid_spec=pltpu.PrefetchScalarGridSpec(
            num_scalar_prefetch=0,
            grid=grid,
            # Same tile shape for input and output; block index j addresses
            # output-length tiles, which are valid input tiles too because
            # the chomp keeps the leading l_out elements (offset 0).  Ragged
            # row / length tails are masked by Pallas.
            in_specs=[pl.BlockSpec((tr, tl), lambda i, j: (i, j))],
            out_specs=pl.BlockSpec((tr, tl), lambda i, j: (i, j)),
        ),
        compiler_params=pltpu.CompilerParams(
            dimension_semantics=("parallel", "parallel"),
            # 4 x 4 MiB double-buffered blocks = 16 MiB: raise v5e's 16 MiB
            # default scoped-VMEM ceiling; 32 MiB is already the v6e/v7x
            # default and far below every chip's physical VMEM.
            vmem_limit_bytes=32 * 1024 * 1024,
        ),
    )(x2)

    return out2.reshape(n, c, l_out)


if __name__ == "__main__":
    key = jax.random.PRNGKey(0)

    # Primary example consistent with the module's forward:
    # conv1d-style activation tensor (N, C, L) with a chomp of 3.
    N, C, L = 2, 4, 16
    chomp_size = 3
    x = jax.random.normal(key, (N, C, L), dtype=jnp.float32)

    out = jax.block_until_ready(chomp1d(x, chomp_size))
    ref = x[:, :, :-chomp_size]
    assert out.shape == (N, C, L - chomp_size), out.shape
    assert out.dtype == x.dtype
    assert jnp.array_equal(out, ref), "mismatch vs reference slice"

    # Multi-tile grid + ragged tail path: a tiny byte budget forces several
    # row tiles and length tiles with a non-128-aligned l_out.
    key2 = jax.random.PRNGKey(0)
    N2, C2, L2, chomp2 = 2, 16, 300, 5
    x2 = jax.random.normal(key2, (N2, C2, L2), dtype=jnp.float32)
    out2 = jax.block_until_ready(chomp1d(x2, chomp2, block_bytes=8 * 1024))
    ref2 = x2[:, :, :-chomp2]
    assert out2.shape == (N2, C2, L2 - chomp2), out2.shape
    assert jnp.array_equal(out2, ref2), "mismatch vs reference slice (tiled case)"

    # Dtype-aware path (bf16 -> sublane pack 16, block stays byte-budgeted).
    x3 = jax.random.normal(jax.random.PRNGKey(0), (N, C, L), dtype=jnp.bfloat16)
    out3 = jax.block_until_ready(chomp1d(x3, chomp_size))
    assert jnp.array_equal(out3, x3[:, :, :-chomp_size]), "mismatch (bf16 case)"

    print("KERNEL_OK")
</pallas_src>

<mosaic_0001>
module attributes {stable_mosaic.version = 11 : i64} {
  func.func @_copy_tile_kernel(%arg0: i32, %arg1: i32, %arg2: memref<8x128xf32, #tpu.memory_space<vmem>>, %arg3: memref<8x128xf32, #tpu.memory_space<vmem>>) attributes {dimension_semantics = [#tpu.dimension_semantics<parallel>, #tpu.dimension_semantics<parallel>], iteration_bounds = array<i64: 1, 1>, scalar_prefetch = 0 : i64, scratch_operands = 0 : i64, tpu.core_type = #tpu.core_type<tc>, window_params = [{transform_indices = @transform_0, window_bounds = array<i64: 8, 128>}, {transform_indices = @transform_1, window_bounds = array<i64: 8, 128>}]} {
    %c0 = arith.constant 0 : index
    %c0_0 = arith.constant 0 : index
    %0 = vector.load %arg2[%c0, %c0_0] : memref<8x128xf32, #tpu.memory_space<vmem>>, vector<8x128xf32>
    %c0_1 = arith.constant 0 : index
    %c0_2 = arith.constant 0 : index
    %1 = vector.load %arg3[%c0_1, %c0_2] : memref<8x128xf32, #tpu.memory_space<vmem>>, vector<8x128xf32>
    tpu.vector_store %arg3[%c0_1, %c0_2], %0 {strides = array<i32>} : memref<8x128xf32, #tpu.memory_space<vmem>>, vector<8x128xf32>,
    return
  }
  func.func @transform_0(%arg0: i32, %arg1: i32) -> (i32, i32) {
    %c0_i32 = arith.constant 0 : i32
    return %arg0, %arg1 : i32, i32
  }
  func.func @transform_1(%arg0: i32, %arg1: i32) -> (i32, i32) {
    %c0_i32 = arith.constant 0 : i32
    return %arg0, %arg1 : i32, i32
  }
}

</mosaic_0001>

<bundles_post_ra>
// kernel: tpu_custom_call.1
= control target key start
LH: loop header
LB: loop body
LE: loop exit
PB: predicated region body
PF: predicated region fallthrough
CT: control target
= control target key end

     0   :  { %6 = vsyncpa [#allocation3], 0  ;;  %s102_s0 = inlined_call_operand.hbm [shape: f32[8,16], index: 0, kind: input, shape index: {}]   ;;  %s103_s1 = inlined_call_operand.hbm [shape: f32[8,13], index: 1, kind: output, shape index: {}]  }
   0x1   :  { %7 = vsyncpa [#allocation4], 0  ;;  %s84_s6 = smov [#allocation2]  }
   0x2   :  { %s14_s7 = sshll.u32 %s84_s6, 4  ;;  %s15_s7 = int_to_ptr.vmem [resolvable:$true] %s14_s7 }
   0x3   :  { %s48_s8 = scalar_lea.vmem %s15_s7, 128  ;;  %p53_p1 = scmp.lt.s32.totalorder %s15_s7, %s15_s7 }
   0x4   :  { %p49_p0 = scmp.ne.s32.totalorder %s15_s7, %s48_s8  ;;  %p54_p2 = scmp.lt.s32.totalorder %s48_s8, %s48_s8 }
   0x6   :  { %p55_p3 = por %p54_p2, %p53_p1 }
   0x8   :  { %p56_p4 = pnand %p55_p3, %p49_p0 }
   0xa   :  { %59 = shalt.err (!%p56_p4)
}
   0xb   :  { %17 = dma.hbm_to_vmem [thread:$0]  %s102_s0, 128, %s15_s7, [#allocation3]  }
   0xc   :  { %80 = dma.done.wait [#allocation3], 128  }
   0xd   :  { %81 = vsyncadd [#allocation3], 4294967168  ;;  %s85_s11 = smov [#allocation5]   ;;  %v21_v0 = vld [vmem:[#allocation2] sm:$0xff] }
   0xe   :  { %s29_s12 = sshll.u32 %s85_s11, 4  ;;  %22 = vst [vmem:[#allocation5] sm:$0xff] %v21_v0  ;;  %s30_s12 = int_to_ptr.vmem [resolvable:$true] %s29_s12 }
   0xf   :  { %s60_s13 = scalar_lea.vmem %s30_s12, 128  ;;  %p65_p6 = scmp.lt.s32.totalorder %s30_s12, %s30_s12 }
  0x10   :  { %p61_p5 = scmp.ne.s32.totalorder %s30_s12, %s60_s13  ;;  %p66_p7 = scmp.lt.s32.totalorder %s60_s13, %s60_s13 }
  0x12   :  { %p67_p8 = por %p66_p7, %p65_p6 }
  0x14   :  { %p68_p9 = pnand %p67_p8, %p61_p5 }
  0x16   :  { %71 = shalt.err (!%p68_p9)
}
  0x17   :  { %32 = dma.vmem_to_hbm [thread:$0]  %s30_s12, 128, %s103_s1, [#allocation4]  }
  0x18   :  { %82 = dma.done.wait [#allocation4], 128  }
  0x19   :  { %83 = vsyncadd [#allocation4], 4294967168 }
  0x1a   :  { %36 = vsyncpa [#allocation3], 1 }
  0x1b   :  { %37 = vsyncpa [#allocation4], 1 }

</bundles_post_ra>
